<compile_context>
chip_gen: v7x
topology: tpu7x:2x2x1
jax: 0.10.0
libtpu: 0.0.40
codegen_flags: <defaults>
</compile_context>

<pallas_src>
import functools

import jax
import jax.numpy as jnp
from jax.experimental import pallas as pl
from jax.experimental.pallas import tpu as pltpu

# ---------------- configuration (deterministic "module init") ----------------
LOSS_WEIGHTS = (1.0, 0.5)   # losses_weights
HUBER_DELTA = 1.0           # nn.HuberLoss default delta
LANES = 128                 # lane width
SUBLANES = 8                # f32 sublane tile


# ------------------------------- Pallas kernel -------------------------------
def _comb_loss_kernel(p1_ref, t1_ref, p2_ref, t2_ref, out_ref,
                      *, w1, w2, inv_n1, inv_n2, delta):
    """Single invocation (no grid).

    p1_ref / t1_ref : (rows1, 128) f32 slabs in VMEM (task 1, MSE).
    p2_ref / t2_ref : (rows2, 128) f32 slabs in VMEM (task 2, Huber).
    out_ref         : SMEM f32[1] — the combined weighted loss.

    Zero-padded tail rows contribute 0 to both sums (diff == 0), so dividing
    by the original element counts (inv_n1 / inv_n2) gives exact means.
    """
    # ---- task 1: MSE (sum of squared error) ----
    d1 = p1_ref[...] - t1_ref[...]
    sse = jnp.sum(d1 * d1)

    # ---- task 2: Huber, delta = `delta` ----
    d2 = p2_ref[...] - t2_ref[...]
    a = jnp.abs(d2)
    hub = jnp.where(a < delta, 0.5 * d2 * d2, delta * (a - 0.5 * delta))
    hsum = jnp.sum(hub)

    out_ref[0] = (w1 * sse * inv_n1) + (w2 * hsum * inv_n2)


# --------------------------------- wrapper -----------------------------------
def _to_slab(x):
    """Flatten to f32, zero-pad to a whole number of (8,128) tiles, reshape."""
    flat = jnp.ravel(x).astype(jnp.float32)
    tile = SUBLANES * LANES
    pad = (-flat.size) % tile
    if pad:
        flat = jnp.pad(flat, (0, pad))
    return flat.reshape(flat.size // LANES, LANES)


def combination_loss(preds, targets, weights=LOSS_WEIGHTS, delta=HUBER_DELTA):
    """JAX/Pallas equivalent of ConbinationLoss.forward for
       losses = [MSELoss, HuberLoss(delta)] with the given weights."""
    assert len(preds) == 2 and len(targets) == 2 and len(weights) == 2
    assert preds[0].shape == targets[0].shape
    assert preds[1].shape == targets[1].shape

    p1, t1 = _to_slab(preds[0]), _to_slab(targets[0])
    p2, t2 = _to_slab(preds[1]), _to_slab(targets[1])

    n1 = float(preds[0].size)
    n2 = float(preds[1].size)

    kernel = functools.partial(
        _comb_loss_kernel,
        w1=float(weights[0]), w2=float(weights[1]),
        inv_n1=1.0 / n1, inv_n2=1.0 / n2,
        delta=float(delta))

    vmem = pl.BlockSpec(memory_space=pltpu.MemorySpace.VMEM)
    out = pl.pallas_call(
        kernel,
        out_shape=jax.ShapeDtypeStruct((1,), jnp.float32),
        in_specs=[vmem, vmem, vmem, vmem],
        out_specs=pl.BlockSpec(memory_space=pltpu.MemorySpace.SMEM),
    )(p1, t1, p2, t2)
    return out[0]


# --------------------------- pure-JAX reference -------------------------------
def _reference(preds, targets, weights=LOSS_WEIGHTS, delta=HUBER_DELTA):
    p1, t1 = preds[0].astype(jnp.float32), targets[0].astype(jnp.float32)
    p2, t2 = preds[1].astype(jnp.float32), targets[1].astype(jnp.float32)
    mse = jnp.mean((p1 - t1) ** 2)
    d = p2 - t2
    a = jnp.abs(d)
    hub = jnp.mean(jnp.where(a < delta, 0.5 * d * d, delta * (a - 0.5 * delta)))
    return weights[0] * mse + weights[1] * hub


# ----------------------------------- main -------------------------------------
if __name__ == "__main__":
    key = jax.random.PRNGKey(0)
    k1, k2, k3, k4 = jax.random.split(key, 4)

    # Two tasks, each NCHW (2, 4, 16, 16) -> 2048 elements -> (16, 128) slab.
    shape = (2, 4, 16, 16)
    pred1 = jax.random.normal(k1, shape, dtype=jnp.float32)
    tgt1 = jax.random.normal(k2, shape, dtype=jnp.float32)
    pred2 = jax.random.normal(k3, shape, dtype=jnp.float32) * 2.0  # exercise both Huber branches
    tgt2 = jax.random.normal(k4, shape, dtype=jnp.float32)

    loss = combination_loss((pred1, pred2), (tgt1, tgt2))
    loss = jax.block_until_ready(loss)

    ref = _reference((pred1, pred2), (tgt1, tgt2))
    assert jnp.allclose(loss, ref, rtol=1e-5, atol=1e-5), (loss, ref)

    print("KERNEL_OK")
</pallas_src>

<mosaic_0001>
module attributes {stable_mosaic.version = 11 : i64} {
  func.func @_comb_loss_kernel(%arg0: memref<16x128xf32, #tpu.memory_space<vmem>>, %arg1: memref<16x128xf32, #tpu.memory_space<vmem>>, %arg2: memref<16x128xf32, #tpu.memory_space<vmem>>, %arg3: memref<16x128xf32, #tpu.memory_space<vmem>>, %arg4: memref<1xf32, #tpu.memory_space<smem>>) attributes {dimension_semantics = [], scalar_prefetch = 0 : i64, scratch_operands = 0 : i64, tpu.core_type = #tpu.core_type<tc>} {
    %c0 = arith.constant 0 : index
    %c0_0 = arith.constant 0 : index
    %0 = vector.load %arg0[%c0, %c0_0] : memref<16x128xf32, #tpu.memory_space<vmem>>, vector<16x128xf32>
    %c0_1 = arith.constant 0 : index
    %c0_2 = arith.constant 0 : index
    %1 = vector.load %arg1[%c0_1, %c0_2] : memref<16x128xf32, #tpu.memory_space<vmem>>, vector<16x128xf32>
    %2 = arith.subf %0, %1 : vector<16x128xf32>
    %3 = arith.mulf %2, %2 : vector<16x128xf32>
    %4 = vector.shape_cast %3 : vector<16x128xf32> to vector<1x16x128xf32>
    %cst = arith.constant dense<0.000000e+00> : vector<1xf32>
    %5 = vector.multi_reduction <add>, %4, %cst [1, 2] : vector<1x16x128xf32> to vector<1xf32>
    %6 = vector.shape_cast %5 : vector<1xf32> to vector<1x1x1xf32>
    %7 = vector.extract %6[0, 0, 0] : f32 from vector<1x1x1xf32>
    %c0_3 = arith.constant 0 : index
    %c0_4 = arith.constant 0 : index
    %8 = vector.load %arg2[%c0_3, %c0_4] : memref<16x128xf32, #tpu.memory_space<vmem>>, vector<16x128xf32>
    %c0_5 = arith.constant 0 : index
    %c0_6 = arith.constant 0 : index
    %9 = vector.load %arg3[%c0_5, %c0_6] : memref<16x128xf32, #tpu.memory_space<vmem>>, vector<16x128xf32>
    %10 = arith.subf %8, %9 : vector<16x128xf32>
    %11 = math.absf %10 : vector<16x128xf32>
    %cst_7 = arith.constant 1.000000e+00 : f32
    %12 = vector.broadcast %cst_7 : f32 to vector<16x128xf32>
    %13 = arith.cmpf olt, %11, %12 : vector<16x128xf32>
    %cst_8 = arith.constant 5.000000e-01 : f32
    %14 = vector.broadcast %cst_8 : f32 to vector<16x128xf32>
    %15 = arith.mulf %14, %10 : vector<16x128xf32>
    %16 = arith.mulf %15, %10 : vector<16x128xf32>
    %cst_9 = arith.constant 5.000000e-01 : f32
    %17 = vector.broadcast %cst_9 : f32 to vector<16x128xf32>
    %18 = arith.subf %11, %17 : vector<16x128xf32>
    %cst_10 = arith.constant 1.000000e+00 : f32
    %19 = vector.broadcast %cst_10 : f32 to vector<16x128xf32>
    %20 = arith.mulf %19, %18 : vector<16x128xf32>
    %21 = arith.select %13, %16, %20 : vector<16x128xi1>, vector<16x128xf32>
    %22 = vector.shape_cast %21 : vector<16x128xf32> to vector<1x16x128xf32>
    %cst_11 = arith.constant dense<0.000000e+00> : vector<1xf32>
    %23 = vector.multi_reduction <add>, %22, %cst_11 [1, 2] : vector<1x16x128xf32> to vector<1xf32>
    %24 = vector.shape_cast %23 : vector<1xf32> to vector<1x1x1xf32>
    %25 = vector.extract %24[0, 0, 0] : f32 from vector<1x1x1xf32>
    %cst_12 = arith.constant 1.000000e+00 : f32
    %26 = arith.mulf %cst_12, %7 : f32
    %cst_13 = arith.constant 4.8828125E-4 : f32
    %27 = arith.mulf %26, %cst_13 : f32
    %cst_14 = arith.constant 5.000000e-01 : f32
    %28 = arith.mulf %cst_14, %25 : f32
    %cst_15 = arith.constant 4.8828125E-4 : f32
    %29 = arith.mulf %28, %cst_15 : f32
    %30 = arith.addf %27, %29 : f32
    %c0_16 = arith.constant 0 : index
    %31 = memref.load %arg4[%c0_16] : memref<1xf32, #tpu.memory_space<smem>>
    memref.store %30, %arg4[%c0_16] : memref<1xf32, #tpu.memory_space<smem>>
    return
  }
}

</mosaic_0001>

<bundles_post_ra>
// kernel: tpu_custom_call.1
= control target key start
LH: loop header
LB: loop body
LE: loop exit
PB: predicated region body
PF: predicated region fallthrough
CT: control target
= control target key end

     0   :  { %9 = vsyncpa [#allocation3], 0  ;;  %s378_s0 = inlined_call_operand.hbm [shape: f32[16,128], index: 0, kind: input, shape index: {}]   ;;  %s379_s1 = inlined_call_operand.hbm [shape: f32[16,128], index: 1, kind: input, shape index: {}]   ;;  %s380_s2 = inlined_call_operand.hbm [shape: f32[16,128], index: 2, kind: input, shape index: {}]   ;;  %s381_s3 = inlined_call_operand.hbm [shape: f32[16,128], index: 3, kind: input, shape index: {}]   ;;  %s382_s4 = inlined_call_operand.hbm [shape: f32[1], index: 4, kind: output, shape index: {}]  }
   0x1   :  { %10 = vsyncpa [#allocation6], 0 }
   0x2   :  { %11 = vsyncpa [#allocation9], 0 }
   0x3   :  { %12 = vsyncpa [#allocation4], 0  ;;  %s260_s15 = smov [#allocation5]   ;;  %s261_s17 = smov [#allocation2]  }
   0x4   :  { %s30_s16 = sshll.u32 %s260_s15, 4  ;;  %s18_s18 = sshll.u32 %s261_s17, 4  ;;  %s31_s16 = int_to_ptr.vmem [resolvable:$true] %s30_s16  ;;  %s292_s18 = int_to_ptr.vmem [resolvable:$true] %s18_s18 }
   0x5   :  { %s154_s21 = scalar_lea.hbm %s379_s1, 256 }
   0x6   :  { %p155_p0 = scmp.ne.s32.totalorder %s379_s1, %s154_s21  ;;  %p158_p1 = scmp.lt.u32.totalorder %s154_s21, %s379_s1 }
   0x8   :  { %p160_p2 = pnand %p158_p1, %p155_p0 }
   0xa   :  { %163 = shalt.err (!%p160_p2)
}
   0xb   :  { %s164_s26 = scalar_lea.vmem %s31_s16, 256  ;;  %p169_p4 = scmp.lt.s32.totalorder %s31_s16, %s31_s16 }
   0xc   :  { %p165_p3 = scmp.ne.s32.totalorder %s31_s16, %s164_s26  ;;  %p170_p5 = scmp.lt.s32.totalorder %s164_s26, %s164_s26 }
   0xe   :  { %p171_p6 = por %p170_p5, %p169_p4 }
  0x10   :  { %p172_p7 = pnand %p171_p6, %p165_p3 }
  0x12   :  { %175 = shalt.err (!%p172_p7)
}
  0x13   :  { %s262_s27 = smov 128   ;;  %s263_s28 = smov 8  }
  0x14   :  { %36 = dma.hbm_to_vmem [thread:$0]  %s379_s1, 256, %s31_s16, [#allocation6], %s262_s27, %s262_s27, %s263_s28  }
  0x15   :  { %s176_s7 = scalar_lea.hbm %s378_s0, 256 }
  0x16   :  { %p177_p8 = scmp.ne.s32.totalorder %s378_s0, %s176_s7  ;;  %p180_p9 = scmp.lt.u32.totalorder %s176_s7, %s378_s0 }
  0x18   :  { %p182_p10 = pnand %p180_p9, %p177_p8 }
  0x1a   :  { %185 = shalt.err (!%p182_p10)
}
  0x1b   :  { %s186_s12 = scalar_lea.vmem %s292_s18, 256  ;;  %p191_p12 = scmp.lt.s32.totalorder %s292_s18, %s292_s18 }
  0x1c   :  { %p187_p11 = scmp.ne.s32.totalorder %s292_s18, %s186_s12  ;;  %p192_p13 = scmp.lt.s32.totalorder %s186_s12, %s186_s12 }
  0x1e   :  { %p193_p0 = por %p192_p13, %p191_p12 }
  0x20   :  { %p194_p1 = pnand %p193_p0, %p187_p11 }
  0x22   :  { %197 = shalt.err (!%p194_p1)
}
  0x23   :  { %24 = dma.hbm_to_vmem [thread:$0]  %s378_s0, 256, %s292_s18, [#allocation3], %s262_s27, %s262_s27, %s263_s28  }
  0x24   :  { %s264_s14 = smov [#allocation7]   ;;  %s265_s16 = smov [#allocation8]  }
  0x25   :  { %s42_s15 = sshll.u32 %s264_s14, 4  ;;  %s54_s17 = sshll.u32 %s265_s16, 4  ;;  %s43_s15 = int_to_ptr.vmem [resolvable:$true] %s42_s15  ;;  %s329_s17 = int_to_ptr.vmem [resolvable:$true] %s54_s17 }
  0x26   :  { %s198_s21 = scalar_lea.hbm %s380_s2, 256 }
  0x27   :  { %p199_p2 = scmp.ne.s32.totalorder %s380_s2, %s198_s21  ;;  %p202_p3 = scmp.lt.u32.totalorder %s198_s21, %s380_s2 }
  0x29   :  { %p204_p4 = pnand %p202_p3, %p199_p2 }
  0x2b   :  { %207 = shalt.err (!%p204_p4)
}
  0x2c   :  { %s208_s0 = scalar_lea.vmem %s43_s15, 256  ;;  %p213_p6 = scmp.lt.s32.totalorder %s43_s15, %s43_s15 }
  0x2d   :  { %p209_p5 = scmp.ne.s32.totalorder %s43_s15, %s208_s0  ;;  %p214_p7 = scmp.lt.s32.totalorder %s208_s0, %s208_s0 }
  0x2f   :  { %p215_p8 = por %p214_p7, %p213_p6 }
  0x31   :  { %p216_p9 = pnand %p215_p8, %p209_p5 }
  0x33   :  { %219 = shalt.err (!%p216_p9)
}
  0x34   :  { %48 = dma.hbm_to_vmem [thread:$0]  %s380_s2, 256, %s43_s15, [#allocation6], %s262_s27, %s262_s27, %s263_s28  }
  0x35   :  { %s220_s5 = scalar_lea.hbm %s381_s3, 256 }
  0x36   :  { %p221_p10 = scmp.ne.s32.totalorder %s381_s3, %s220_s5  ;;  %p224_p11 = scmp.lt.u32.totalorder %s220_s5, %s381_s3 }
  0x38   :  { %p226_p12 = pnand %p224_p11, %p221_p10 }
  0x3a   :  { %229 = shalt.err (!%p226_p12)
}
  0x3b   :  { %s230_s10 = scalar_lea.vmem %s329_s17, 256  ;;  %p235_p0 = scmp.lt.s32.totalorder %s329_s17, %s329_s17 }
  0x3c   :  { %p231_p13 = scmp.ne.s32.totalorder %s329_s17, %s230_s10  ;;  %p236_p1 = scmp.lt.s32.totalorder %s230_s10, %s230_s10 }
  0x3e   :  { %p237_p2 = por %p236_p1, %p235_p0 }
  0x40   :  { %p238_p3 = pnand %p237_p2, %p231_p13 }
  0x42   :  { %241 = shalt.err (!%p238_p3)
}
  0x43   :  { %60 = dma.hbm_to_vmem [thread:$0]  %s381_s3, 256, %s329_s17, [#allocation9], %s262_s27, %s262_s27, %s263_s28  }
  0x44   :  { %252 = dma.done.wait [#allocation3], 256  }
  0x45   :  { %253 = vsyncadd [#allocation3], 4294967040 }
  0x46   :  { %254 = dma.done.wait [#allocation6], 512  }
  0x47   :  { %255 = vsyncadd [#allocation6], 4294966784 }
  0x48   :  { %256 = dma.done.wait [#allocation9], 256  }
  0x49   :  { %257 = vsyncadd [#allocation9], 4294967040  ;;  %v73_v0 = vld [vmem:[#allocation2] sm:$0xff]  ;;  %v74_v1 = vld [vmem:[#allocation2 + $0x8] sm:$0xff]  ;;  %s242_s16 = scalar_lea.hbm %s382_s4, 16 }
  0x4a   :  { %v75_v2 = vld [vmem:[#allocation5] sm:$0xff]  ;;  %v76_v3 = vld [vmem:[#allocation5 + $0x8] sm:$0xff]  ;;  %v91_v5 = vld [vmem:[#allocation7] sm:$0xff]  ;;  %p243_p4 = scmp.ne.s32.totalorder %s382_s4, %s242_s16  ;;  %p246_p5 = scmp.lt.u32.totalorder %s242_s16, %s382_s4 }
  0x4b   :  { %v77_v4 = vsub.f32 %v73_v0, %v75_v2  ;;  %v92_v6 = vld [vmem:[#allocation7 + $0x8] sm:$0xff]  ;;  %v78_v7 = vsub.f32 %v74_v1, %v76_v3  ;;  %v93_v8 = vld [vmem:[#allocation8] sm:$0xff]  ;;  %v94_v9 = vld [vmem:[#allocation8 + $0x8] sm:$0xff] }
  0x4c   :  { %v95_v11 = vsub.f32 %v91_v5, %v93_v8  ;;  %v96_v12 = vsub.f32 %v92_v6, %v94_v9  ;;  %p248_p6 = pnand %p246_p5, %p243_p4 }
  0x4d   :  { %v79_v10 = vmul.f32 %v77_v4, %v77_v4  ;;  %v80_v13 = vmul.f32 %v78_v7, %v78_v7 }
  0x4e   :  { %v97_v14 = vand.u32 2147483647, %v95_v11  ;;  %v98_v15 = vand.u32 2147483647, %v96_v12  ;;  %v101_v16 = vmul.f32 0.5, %v95_v11  ;;  %v102_v17 = vmul.f32 0.5, %v96_v12 }
  0x4f   :  { %v81_v18 = vadd.f32 %v80_v13, %v79_v10 }
  0x50   :  { %vm99_vm0 = vcmp.lt.f32.partialorder %v97_v14, 1.0  ;;  %vm100_vm1 = vcmp.lt.f32.partialorder %v98_v15, 1.0  ;;  %v103_v19 = vmul.f32 %v101_v16, %v95_v11  ;;  %v104_v20 = vmul.f32 %v102_v17, %v96_v12 }
  0x51   :  { %82 = vadd.xlane.f32.xlu0 %v81_v18  ;;  %v141_v21 = vadd.f32 -0.5, %v97_v14  ;;  %v142_v22 = vadd.f32 -0.5, %v98_v15 }
  0x53   :  { %v107_v23 = vsel %vm99_vm0, %v103_v19, %v141_v21  ;;  %v108_v24 = vsel %vm100_vm1, %v104_v20, %v142_v22 }
  0x54   :  { %v109_v25 = vadd.f32 %v108_v24, %v107_v23 }
  0x56   :  { %110 = vadd.xlane.f32.xlu0 %v109_v25 }
  0xde   :  { %v83_v26 = vpop.xlane.xlu0 %82 }
  0xdf   :  { %v84_v27 = vrot.slane %v83_v26, 4 }
  0xe1   :  { %v85_v28 = vadd.f32 %v84_v27, %v83_v26 }
  0xe3   :  { %v86_v29 = vrot.slane %v85_v28, 2  ;;  %v111_v30 = vpop.xlane.xlu0 %110 }
  0xe4   :  { %v112_v31 = vrot.slane %v111_v30, 4 }
  0xe5   :  { %v87_v32 = vadd.f32 %v86_v29, %v85_v28 }
  0xe6   :  { %v113_v33 = vadd.f32 %v112_v31, %v111_v30 }
  0xe7   :  { %v88_v34 = vrot.slane %v87_v32, 1 }
  0xe8   :  { %v114_v35 = vrot.slane %v113_v33, 2 }
  0xe9   :  { %v89_v36 = vadd.f32 %v88_v34, %v87_v32 }
  0xea   :  { %v115_v37 = vadd.f32 %v114_v35, %v113_v33 }
  0xeb   :  { %143 = vpush %v89_v36 }
  0xec   :  { %v116_v38 = vrot.slane %v115_v37, 1 }
  0xee   :  { %v117_v39 = vadd.f32 %v116_v38, %v115_v37 }
  0xf0   :  { %145 = vpush %v117_v39 }
 0x11c   :  { %s144_s3 = spop %143 }
 0x11d   :  { %s119_s12 = smul.f32 0.00048828125, %s144_s3 }
 0x121   :  { %s146_s27 = spop %145 }
 0x122   :  { %s120_s28 = smul.f32 0.5, %s146_s27 }
 0x124   :  { %s121_s1 = smul.f32 0.00048828125, %s120_s28 }
 0x126   :  { %s122_s13 = sadd.f32 %s121_s1, %s119_s12 }
 0x128   :  { %124 = sst [smem:[#allocation10]] %s122_s13 }
 0x129   :  { %251 = shalt.err (!%p248_p6)
}
 0x12a   :  { %s266_s22 = smov [#allocation10]  }
 0x12b   :  { %132 = dma.smem_to_hbm %s266_s22, 16, %s382_s4, [#allocation4]  }
 0x12c   :  { %258 = dma.done.wait [#allocation4], 16  }
 0x12d   :  { %259 = vsyncadd [#allocation4], 4294967280 }
 0x12e   :  { %136 = sfence }
 0x12f   :  { %137 = vsyncpa [#allocation3], 1 }
 0x130   :  { %138 = vsyncpa [#allocation6], 1 }
 0x131   :  { %139 = vsyncpa [#allocation9], 1 }
 0x132   :  { %140 = vsyncpa [#allocation4], 1 }

</bundles_post_ra>
